<compile_context>
chip_gen: v7x
topology: tpu7x:2x2x1
jax: 0.10.0
libtpu: 0.0.40
codegen_flags: <defaults>
</compile_context>

<pallas_src>
import functools

import jax
import jax.numpy as jnp
from jax.experimental import pallas as pl
from jax.experimental.pallas import tpu as pltpu


def _conv_stats_kernel(x_ref, m_ref, y_ref, s1_ref, s2_ref, im2row_ref, *,
                       KH, IB, H, TM, pad):
    """Conv(KHxKH, stride 1, SAME) for one (image-group, row-tile) grid step, plus running
    per-group BN partial statistics.

    x_ref     : (IB*H, W*Cin)        f32   image group, lane-flattened (w, ci)
    m_ref     : (KH*W*Cin, W*Cout)   bf16  banded-Toeplitz weight (horizontal pad folded in)
    y_ref     : (TM, W*Cout)         bf16  conv output rows for this tile
    s1_ref    : (1, 1, W*Cout)       f32   running sum over row tiles (same block for all t)
    s2_ref    : (1, 1, W*Cout)       f32   running sum of squares over row tiles
    im2row_ref: (KH, IB*H, W*Cin)    f32   scratch: vertically shifted copies of the group,
                                           zero rows at each image's top/bottom boundary
    """
    t = pl.program_id(1)
    WCin = x_ref.shape[1]

    @pl.when(t == 0)
    def _():
        s1_ref[...] = jnp.zeros_like(s1_ref)
        s2_ref[...] = jnp.zeros_like(s2_ref)
        # Stage the im2row view of this image group once; only the pad rows are zeroed.
        for i in range(IB):                 # static unroll over images in the group
            base = i * H
            for kh in range(KH):            # static unroll over vertical taps
                dst_lo = max(0, pad - kh)
                dst_hi = min(H, H + pad - kh)
                src_lo = dst_lo + kh - pad
                src_hi = dst_hi + kh - pad
                if dst_lo > 0:
                    im2row_ref[kh, base:base + dst_lo, :] = jnp.zeros(
                        (dst_lo, WCin), im2row_ref.dtype)
                if dst_hi < H:
                    im2row_ref[kh, base + dst_hi:base + H, :] = jnp.zeros(
                        (H - dst_hi, WCin), im2row_ref.dtype)
                im2row_ref[kh, base + dst_lo:base + dst_hi, :] = \
                    x_ref[base + src_lo:base + src_hi, :]

    row0 = pl.multiple_of(t * TM, TM)
    # One lane-dense MXU matmul per tile: (TM, KH*W*Cin) x (KH*W*Cin, W*Cout), f32 accumulation.
    lhs = jnp.concatenate(
        [im2row_ref[kh, pl.ds(row0, TM), :] for kh in range(KH)],
        axis=-1).astype(jnp.bfloat16)
    acc = jax.lax.dot_general(
        lhs, m_ref[...],
        dimension_numbers=(((1,), (0,)), ((), ())),
        preferred_element_type=jnp.float32)                          # (TM, W*Cout) f32

    y_ref[...] = acc.astype(y_ref.dtype)
    s1_ref[0] += jnp.sum(acc, axis=0, keepdims=True)                 # row-reduced partial stats
    s2_ref[0] += jnp.sum(acc * acc, axis=0, keepdims=True)


def _bn_relu_kernel(y_ref, scale_ref, shift_ref, o_ref):
    """Fused batch-norm (pre-folded scale/shift) + ReLU on a lane-dense row tile of y."""
    y = y_ref[...].astype(jnp.float32)                               # (R, W*Cout)
    o_ref[...] = jnp.maximum(y * scale_ref[...] + shift_ref[...], 0.0).astype(o_ref.dtype)


def _build_toeplitz_weight(weight, W, pad):
    """Banded-Toeplitz matmul weight (KH*W*Cin, W*Cout) with horizontal SAME padding folded in:
    M[kh*W*Cin + w_in*Cin + ci, w_out*Cout + co] = weight[co, ci, kh, w_in - w_out + pad].

    In a real model this is precomputed once at module init / weight update, not per forward.
    TODO(synk): for large W, tile over w_out so only the KW non-zero bands are multiplied
    (M is O(KH*W^2*Cin*Cout) with ~W/KW structural zeros).
    """
    Cout, Cin, KH, KW = weight.shape
    w_t = jnp.transpose(weight, (2, 3, 1, 0)).astype(jnp.float32)    # (KH, KW, Cin, Cout)
    w_in = jnp.arange(W)[:, None]
    w_out = jnp.arange(W)[None, :]
    kw = w_in - w_out + pad                                          # (W, W)
    valid = (kw >= 0) & (kw < KW)
    g = jnp.where(valid[None, :, :, None, None],
                  w_t[:, jnp.clip(kw, 0, KW - 1)], 0.0)              # (KH, Win, Wout, Cin, Cout)
    M = jnp.transpose(g, (0, 1, 3, 2, 4)).reshape(KH * W * Cin, W * Cout)
    return M.astype(jnp.bfloat16)


def _divisor_tile(total, target, quantum=8):
    """Largest multiple of `quantum` that divides `total` and is <= max(target, quantum)."""
    r = max(quantum, min(target, total))
    r -= r % quantum
    while total % r:
        r -= quantum
    return r


def naives_conv_forward(x_nchw, weight, bias, gamma, beta, *,
                        stride=1, eps=1e-5, m_target=128, bn_row_tile=512):
    """Forward of NaivesConv (Conv2d -> BatchNorm2d (training-mode stats) -> ReLU).

    x_nchw : (N, Cin, H, W) f32, weight : (Cout, Cin, KH, KW) f32 (PyTorch layout),
    bias/gamma/beta : (Cout,).
    """
    assert stride == 1    # TODO(synk): strided conv not implemented (module default is stride=1)
    N, Cin, H, W = x_nchw.shape
    Cout, _, KH, KW = weight.shape
    assert KH == KW and KH % 2 == 1
    assert H % 8 == 0     # TODO(synk): ragged H needs a masked / BoundedSlice tail path
    pad = KH // 2
    WCin, WCout, K3 = W * Cin, W * Cout, KH * W * Cin
    del bias  # a conv bias ahead of train-mode BatchNorm cancels exactly; never computed

    # Images per group: smallest divisor of N whose flattened row count reaches the target matmul
    # M dimension (raises MXU utilisation). Stats are per-group partials reduced in the wrapper,
    # so the group axis stays megacore-parallel.
    IB = N
    for d in range(1, N + 1):
        if N % d == 0 and d * H >= m_target:
            IB = d
            break
    NG = N // IB
    TM = _divisor_tile(IB * H, m_target)     # rows per MXU matmul
    T = (IB * H) // TM

    # --- glue (layout only): NCHW -> lane-flattened (N*H, W*Cin) view ---
    # TODO(synk): in a full model keep NHWC end-to-end to drop this transpose pass.
    x2d = jnp.transpose(x_nchw, (0, 2, 3, 1)).reshape(N * H, WCin).astype(jnp.float32)
    M2 = _build_toeplitz_weight(weight, W, pad)                      # (K3, WCout) bf16

    # Explicit VMEM budget (double-buffered blocks + scratch + live-value headroom).
    vmem_est = (2 * IB * H * WCin * 4        # x blocks (f32)
                + 2 * K3 * WCout * 2         # Toeplitz weight blocks (bf16)
                + 2 * TM * WCout * 2         # y blocks (bf16)
                + 8 * WCout * 4              # stats blocks (f32)
                + KH * IB * H * WCin * 4     # im2row scratch (f32)
                + 2 * TM * (K3 * 2 + WCout * 4))
    vmem_limit = int(min(64 * 1024 * 1024, max(32 * 1024 * 1024, 2 * vmem_est)))

    conv_kernel = functools.partial(_conv_stats_kernel, KH=KH, IB=IB, H=H, TM=TM, pad=pad)
    y, s1, s2 = pl.pallas_call(
        conv_kernel,
        out_shape=(
            jax.ShapeDtypeStruct((N * H, WCout), jnp.bfloat16),      # conv activations (bf16)
            jax.ShapeDtypeStruct((NG, 1, WCout), jnp.float32),       # per-group sum
            jax.ShapeDtypeStruct((NG, 1, WCout), jnp.float32),       # per-group sum of squares
        ),
        grid=(NG, T),
        in_specs=[
            pl.BlockSpec((IB * H, WCin), lambda g, t: (g, 0)),
            pl.BlockSpec((K3, WCout), lambda g, t: (0, 0)),
        ],
        out_specs=(
            pl.BlockSpec((TM, WCout), lambda g, t: (g * T + t, 0)),
            pl.BlockSpec((1, 1, WCout), lambda g, t: (g, 0, 0)),     # accumulated over t
            pl.BlockSpec((1, 1, WCout), lambda g, t: (g, 0, 0)),     # accumulated over t
        ),
        scratch_shapes=[pltpu.VMEM((KH, IB * H, WCin), jnp.float32)],
        compiler_params=pltpu.CompilerParams(
            dimension_semantics=("parallel", "arbitrary"),
            vmem_limit_bytes=vmem_limit),
    )(x2d, M2)

    # --- glue: finish training-mode BN statistics (tiny reduce; no extra pass over y) ---
    cnt = float(N * H * W)
    ssum = s1.reshape(NG, W, Cout).sum(axis=(0, 1))
    ssq = s2.reshape(NG, W, Cout).sum(axis=(0, 1))
    mean = ssum / cnt
    var = jnp.maximum(ssq / cnt - mean * mean, 0.0)   # clamp: E[x^2]-E[x]^2 can dip negative
    # TODO(synk): for very large N*H*W use a shifted / Welford-style accumulation instead.
    scale_c = gamma.astype(jnp.float32) * jax.lax.rsqrt(var + eps)
    shift_c = beta.astype(jnp.float32) - mean * scale_c
    scale_l = jnp.tile(scale_c, W).reshape(1, WCout)
    shift_l = jnp.tile(shift_c, W).reshape(1, WCout)

    # --- Pallas kernel 2: fused BN + ReLU on large lane-dense row tiles; its bf16 output is
    #     aliased onto y (dead afterwards) so no new HBM allocation is made. ---
    R = _divisor_tile(N * H, bn_row_tile)
    out = pl.pallas_call(
        _bn_relu_kernel,
        out_shape=jax.ShapeDtypeStruct((N * H, WCout), jnp.bfloat16),
        grid=(N * H // R,),
        in_specs=[
            pl.BlockSpec((R, WCout), lambda r: (r, 0)),
            pl.BlockSpec((1, WCout), lambda r: (0, 0)),
            pl.BlockSpec((1, WCout), lambda r: (0, 0)),
        ],
        out_specs=pl.BlockSpec((R, WCout), lambda r: (r, 0)),
        input_output_aliases={0: 0},
        compiler_params=pltpu.CompilerParams(
            dimension_semantics=("parallel",)),
    )(y, scale_l, shift_l)

    # back to PyTorch NCHW convention (layout/cast-only epilogue)
    return jnp.transpose(out.reshape(N, H, W, Cout).astype(jnp.float32), (0, 3, 1, 2))


def _reference_forward(x_nchw, weight, bias, gamma, beta, eps=1e-5):
    """Pure-JAX reference (lax conv + bias + training-mode BN + ReLU) for a sanity check."""
    y = jax.lax.conv_general_dilated(
        x_nchw, weight, window_strides=(1, 1), padding="SAME",
        dimension_numbers=("NCHW", "OIHW", "NCHW"))
    y = y + bias[None, :, None, None]
    mean = jnp.mean(y, axis=(0, 2, 3), keepdims=True)
    var = jnp.mean(jnp.square(y - mean), axis=(0, 2, 3), keepdims=True)
    y = (y - mean) * jax.lax.rsqrt(var + eps)
    y = y * gamma[None, :, None, None] + beta[None, :, None, None]
    return jnp.maximum(y, 0.0)


if __name__ == "__main__":
    # Small shapes consistent with NaivesConv(inplanes=4, planes=8, kernel_size=3)
    N, Cin, H, W = 2, 4, 16, 16
    Cout, K = 8, 3

    key = jax.random.PRNGKey(0)
    kx, kw_, kb = jax.random.split(key, 3)
    x = jax.random.normal(kx, (N, Cin, H, W), dtype=jnp.float32)
    weight = 0.1 * jax.random.normal(kw_, (Cout, Cin, K, K), dtype=jnp.float32)
    bias = 0.05 * jax.random.normal(kb, (Cout,), dtype=jnp.float32)
    gamma = 1.0 + 0.1 * jnp.arange(Cout, dtype=jnp.float32)     # deterministic BN affine
    beta = 0.02 * jnp.arange(Cout, dtype=jnp.float32)

    out = jax.block_until_ready(naives_conv_forward(x, weight, bias, gamma, beta))
    ref = jax.block_until_ready(_reference_forward(x, weight, bias, gamma, beta))
    assert out.shape == (N, Cout, H, W)
    # bf16 weights/activations on the kernel path vs an all-f32 reference.
    assert bool(jnp.allclose(out, ref, rtol=3e-2, atol=3e-2))

    print("KERNEL_OK")
</pallas_src>

<mosaic_0001>
module attributes {stable_mosaic.version = 11 : i64} {
  func.func @_conv_stats_kernel(%arg0: i32, %arg1: i32, %arg2: memref<32x64xf32, #tpu.memory_space<vmem>>, %arg3: memref<192x128xbf16, #tpu.memory_space<vmem>>, %arg4: memref<32x128xbf16, #tpu.memory_space<vmem>>, %arg5: memref<1x1x128xf32, #tpu.memory_space<vmem>>, %arg6: memref<1x1x128xf32, #tpu.memory_space<vmem>>, %arg7: memref<3x32x64xf32, #tpu.memory_space<vmem>>) attributes {dimension_semantics = [#tpu.dimension_semantics<parallel>, #tpu.dimension_semantics<arbitrary>], iteration_bounds = array<i64: 1, 1>, scalar_prefetch = 0 : i64, scratch_operands = 1 : i64, tpu.core_type = #tpu.core_type<tc>, window_params = [{transform_indices = @transform_0, window_bounds = array<i64: 32, 64>}, {pipeline_mode = #tpu.pipeline_mode<synchronous>, transform_indices = @transform_1, window_bounds = array<i64: 192, 128>}, {transform_indices = @transform_2, window_bounds = array<i64: 32, 128>}, {transform_indices = @transform_3, window_bounds = array<i64: 1, 1, 128>}, {transform_indices = @transform_4, window_bounds = array<i64: 1, 1, 128>}]} {
    %c0_i32 = arith.constant 0 : i32
    %0 = arith.cmpi eq, %arg1, %c0_i32 : i32
    %1 = arith.extui %0 : i1 to i32
    %c0_i32_0 = arith.constant 0 : i32
    %2 = arith.cmpi ne, %1, %c0_i32_0 : i32
    scf.if %2 {
      %cst_22 = arith.constant 0.000000e+00 : f32
      %37 = vector.broadcast %cst_22 : f32 to vector<1x1x128xf32>
      %c0_23 = arith.constant 0 : index
      %c0_24 = arith.constant 0 : index
      %c0_25 = arith.constant 0 : index
      %38 = vector.load %arg5[%c0_23, %c0_24, %c0_25] : memref<1x1x128xf32, #tpu.memory_space<vmem>>, vector<1x1x128xf32>
      tpu.vector_store %arg5[%c0_23, %c0_24, %c0_25], %37 {strides = array<i32>} : memref<1x1x128xf32, #tpu.memory_space<vmem>>, vector<1x1x128xf32>,
      %cst_26 = arith.constant 0.000000e+00 : f32
      %39 = vector.broadcast %cst_26 : f32 to vector<1x1x128xf32>
      %c0_27 = arith.constant 0 : index
      %c0_28 = arith.constant 0 : index
      %c0_29 = arith.constant 0 : index
      %40 = vector.load %arg6[%c0_27, %c0_28, %c0_29] : memref<1x1x128xf32, #tpu.memory_space<vmem>>, vector<1x1x128xf32>
      tpu.vector_store %arg6[%c0_27, %c0_28, %c0_29], %39 {strides = array<i32>} : memref<1x1x128xf32, #tpu.memory_space<vmem>>, vector<1x1x128xf32>,
      %cst_30 = arith.constant 0.000000e+00 : f32
      %41 = vector.broadcast %cst_30 : f32 to vector<1x64xf32>
      %c0_31 = arith.constant 0 : index
      %c0_32 = arith.constant 0 : index
      %c0_33 = arith.constant 0 : index
      %42 = vector.load %arg7[%c0_31, %c0_32, %c0_33] : memref<3x32x64xf32, #tpu.memory_space<vmem>>, vector<1x1x64xf32>
      %43 = vector.shape_cast %42 : vector<1x1x64xf32> to vector<1x64xf32>
      %44 = vector.shape_cast %41 : vector<1x64xf32> to vector<1x1x64xf32>
      tpu.vector_store %arg7[%c0_31, %c0_32, %c0_33], %44 {strides = array<i32>} : memref<3x32x64xf32, #tpu.memory_space<vmem>>, vector<1x1x64xf32>,
      %c0_34 = arith.constant 0 : index
      %c0_35 = arith.constant 0 : index
      %45 = vector.load %arg2[%c0_34, %c0_35] : memref<32x64xf32, #tpu.memory_space<vmem>>, vector<15x64xf32>
      %c0_36 = arith.constant 0 : index
      %c1_37 = arith.constant 1 : index
      %c0_38 = arith.constant 0 : index
      %46 = vector.load %arg7[%c0_36, %c1_37, %c0_38] : memref<3x32x64xf32, #tpu.memory_space<vmem>>, vector<1x15x64xf32>
      %47 = vector.shape_cast %46 : vector<1x15x64xf32> to vector<15x64xf32>
      %48 = vector.shape_cast %45 : vector<15x64xf32> to vector<1x15x64xf32>
      tpu.vector_store %arg7[%c0_36, %c1_37, %c0_38], %48 {strides = array<i32>} : memref<3x32x64xf32, #tpu.memory_space<vmem>>, vector<1x15x64xf32>,
      %c0_39 = arith.constant 0 : index
      %c0_40 = arith.constant 0 : index
      %49 = vector.load %arg2[%c0_39, %c0_40] : memref<32x64xf32, #tpu.memory_space<vmem>>, vector<16x64xf32>
      %c1_41 = arith.constant 1 : index
      %c0_42 = arith.constant 0 : index
      %c0_43 = arith.constant 0 : index
      %50 = vector.load %arg7[%c1_41, %c0_42, %c0_43] : memref<3x32x64xf32, #tpu.memory_space<vmem>>, vector<1x16x64xf32>
      %51 = vector.shape_cast %50 : vector<1x16x64xf32> to vector<16x64xf32>
      %52 = vector.shape_cast %49 : vector<16x64xf32> to vector<1x16x64xf32>
      tpu.vector_store %arg7[%c1_41, %c0_42, %c0_43], %52 {strides = array<i32>} : memref<3x32x64xf32, #tpu.memory_space<vmem>>, vector<1x16x64xf32>,
      %cst_44 = arith.constant 0.000000e+00 : f32
      %53 = vector.broadcast %cst_44 : f32 to vector<1x64xf32>
      %c2_45 = arith.constant 2 : index
      %c15 = arith.constant 15 : index
      %c0_46 = arith.constant 0 : index
      %54 = vector.load %arg7[%c2_45, %c15, %c0_46] : memref<3x32x64xf32, #tpu.memory_space<vmem>>, vector<1x1x64xf32>
      %55 = vector.shape_cast %54 : vector<1x1x64xf32> to vector<1x64xf32>
      %56 = vector.shape_cast %53 : vector<1x64xf32> to vector<1x1x64xf32>
      tpu.vector_store %arg7[%c2_45, %c15, %c0_46], %56 {strides = array<i32>} : memref<3x32x64xf32, #tpu.memory_space<vmem>>, vector<1x1x64xf32>,
      %c1_47 = arith.constant 1 : index
      %c0_48 = arith.constant 0 : index
      %57 = vector.load %arg2[%c1_47, %c0_48] : memref<32x64xf32, #tpu.memory_space<vmem>>, vector<15x64xf32>
      %c2_49 = arith.constant 2 : index
      %c0_50 = arith.constant 0 : index
      %c0_51 = arith.constant 0 : index
      %58 = vector.load %arg7[%c2_49, %c0_50, %c0_51] : memref<3x32x64xf32, #tpu.memory_space<vmem>>, vector<1x15x64xf32>
      %59 = vector.shape_cast %58 : vector<1x15x64xf32> to vector<15x64xf32>
      %60 = vector.shape_cast %57 : vector<15x64xf32> to vector<1x15x64xf32>
      tpu.vector_store %arg7[%c2_49, %c0_50, %c0_51], %60 {strides = array<i32>} : memref<3x32x64xf32, #tpu.memory_space<vmem>>, vector<1x15x64xf32>,
      %cst_52 = arith.constant 0.000000e+00 : f32
      %61 = vector.broadcast %cst_52 : f32 to vector<1x64xf32>
      %c0_53 = arith.constant 0 : index
      %c16 = arith.constant 16 : index
      %c0_54 = arith.constant 0 : index
      %62 = vector.load %arg7[%c0_53, %c16, %c0_54] : memref<3x32x64xf32, #tpu.memory_space<vmem>>, vector<1x1x64xf32>
      %63 = vector.shape_cast %62 : vector<1x1x64xf32> to vector<1x64xf32>
      %64 = vector.shape_cast %61 : vector<1x64xf32> to vector<1x1x64xf32>
      tpu.vector_store %arg7[%c0_53, %c16, %c0_54], %64 {strides = array<i32>} : memref<3x32x64xf32, #tpu.memory_space<vmem>>, vector<1x1x64xf32>,
      %c16_55 = arith.constant 16 : index
      %c0_56 = arith.constant 0 : index
      %65 = vector.load %arg2[%c16_55, %c0_56] : memref<32x64xf32, #tpu.memory_space<vmem>>, vector<15x64xf32>
      %c0_57 = arith.constant 0 : index
      %c17 = arith.constant 17 : index
      %c0_58 = arith.constant 0 : index
      %66 = vector.load %arg7[%c0_57, %c17, %c0_58] : memref<3x32x64xf32, #tpu.memory_space<vmem>>, vector<1x15x64xf32>
      %67 = vector.shape_cast %66 : vector<1x15x64xf32> to vector<15x64xf32>
      %68 = vector.shape_cast %65 : vector<15x64xf32> to vector<1x15x64xf32>
      tpu.vector_store %arg7[%c0_57, %c17, %c0_58], %68 {strides = array<i32>} : memref<3x32x64xf32, #tpu.memory_space<vmem>>, vector<1x15x64xf32>,
      %c16_59 = arith.constant 16 : index
      %c0_60 = arith.constant 0 : index
      %69 = vector.load %arg2[%c16_59, %c0_60] : memref<32x64xf32, #tpu.memory_space<vmem>>, vector<16x64xf32>
      %c1_61 = arith.constant 1 : index
      %c16_62 = arith.constant 16 : index
      %c0_63 = arith.constant 0 : index
      %70 = vector.load %arg7[%c1_61, %c16_62, %c0_63] : memref<3x32x64xf32, #tpu.memory_space<vmem>>, vector<1x16x64xf32>
      %71 = vector.shape_cast %70 : vector<1x16x64xf32> to vector<16x64xf32>
      %72 = vector.shape_cast %69 : vector<16x64xf32> to vector<1x16x64xf32>
      tpu.vector_store %arg7[%c1_61, %c16_62, %c0_63], %72 {strides = array<i32>} : memref<3x32x64xf32, #tpu.memory_space<vmem>>, vector<1x16x64xf32>,
      %cst_64 = arith.constant 0.000000e+00 : f32
      %73 = vector.broadcast %cst_64 : f32 to vector<1x64xf32>
      %c2_65 = arith.constant 2 : index
      %c31 = arith.constant 31 : index
      %c0_66 = arith.constant 0 : index
      %74 = vector.load %arg7[%c2_65, %c31, %c0_66] : memref<3x32x64xf32, #tpu.memory_space<vmem>>, vector<1x1x64xf32>
      %75 = vector.shape_cast %74 : vector<1x1x64xf32> to vector<1x64xf32>
      %76 = vector.shape_cast %73 : vector<1x64xf32> to vector<1x1x64xf32>
      tpu.vector_store %arg7[%c2_65, %c31, %c0_66], %76 {strides = array<i32>} : memref<3x32x64xf32, #tpu.memory_space<vmem>>, vector<1x1x64xf32>,
      %c17_67 = arith.constant 17 : index
      %c0_68 = arith.constant 0 : index
      %77 = vector.load %arg2[%c17_67, %c0_68] : memref<32x64xf32, #tpu.memory_space<vmem>>, vector<15x64xf32>
      %c2_69 = arith.constant 2 : index
      %c16_70 = arith.constant 16 : index
      %c0_71 = arith.constant 0 : index
      %78 = vector.load %arg7[%c2_69, %c16_70, %c0_71] : memref<3x32x64xf32, #tpu.memory_space<vmem>>, vector<1x15x64xf32>
      %79 = vector.shape_cast %78 : vector<1x15x64xf32> to vector<15x64xf32>
      %80 = vector.shape_cast %77 : vector<15x64xf32> to vector<1x15x64xf32>
      tpu.vector_store %arg7[%c2_69, %c16_70, %c0_71], %80 {strides = array<i32>} : memref<3x32x64xf32, #tpu.memory_space<vmem>>, vector<1x15x64xf32>,
    } else {
    }
    %c32_i32 = arith.constant 32 : i32
    %3 = arith.muli %arg1, %c32_i32 : i32
    %4 = tpu.assume_multiple %3, 32 : i32
    %c0 = arith.constant 0 : index
    %5 = arith.index_cast %4 : i32 to index
    %c0_1 = arith.constant 0 : index
    %6 = vector.load %arg7[%c0, %5, %c0_1] : memref<3x32x64xf32, #tpu.memory_space<vmem>>, vector<1x32x64xf32>
    %7 = vector.shape_cast %6 : vector<1x32x64xf32> to vector<32x64xf32>
    %c1 = arith.constant 1 : index
    %8 = arith.index_cast %4 : i32 to index
    %c0_2 = arith.constant 0 : index
    %9 = vector.load %arg7[%c1, %8, %c0_2] : memref<3x32x64xf32, #tpu.memory_space<vmem>>, vector<1x32x64xf32>
    %10 = vector.shape_cast %9 : vector<1x32x64xf32> to vector<32x64xf32>
    %c2 = arith.constant 2 : index
    %11 = arith.index_cast %4 : i32 to index
    %c0_3 = arith.constant 0 : index
    %12 = vector.load %arg7[%c2, %11, %c0_3] : memref<3x32x64xf32, #tpu.memory_space<vmem>>, vector<1x32x64xf32>
    %13 = vector.shape_cast %12 : vector<1x32x64xf32> to vector<32x64xf32>
    %14 = tpu.concatenate %7, %10, %13 in 1 : vector<32x64xf32>, vector<32x64xf32>, vector<32x64xf32> -> vector<32x192xf32>
    %15 = arith.truncf %14 : vector<32x192xf32> to vector<32x192xbf16>
    %c0_4 = arith.constant 0 : index
    %c0_5 = arith.constant 0 : index
    %16 = vector.load %arg3[%c0_4, %c0_5] : memref<192x128xbf16, #tpu.memory_space<vmem>>, vector<192x128xbf16>
    %cst = arith.constant dense<0.000000e+00> : vector<32x128xf32>
    %17 = tpu.matmul %15, %16, %cst {dimension_numbers = #tpu.dot_dimension_numbers<[1], [0], [0], [1], [0, 0, 1, 1], [], []>} : vector<32x192xbf16>, vector<192x128xbf16>, vector<32x128xf32> -> vector<32x128xf32>
    %18 = arith.truncf %17 : vector<32x128xf32> to vector<32x128xbf16>
    %c0_6 = arith.constant 0 : index
    %c0_7 = arith.constant 0 : index
    %19 = vector.load %arg4[%c0_6, %c0_7] : memref<32x128xbf16, #tpu.memory_space<vmem>>, vector<32x128xbf16>
    tpu.vector_store %arg4[%c0_6, %c0_7], %18 {strides = array<i32>} : memref<32x128xbf16, #tpu.memory_space<vmem>>, vector<32x128xbf16>,
    %c0_8 = arith.constant 0 : index
    %c0_9 = arith.constant 0 : index
    %c0_10 = arith.constant 0 : index
    %20 = vector.load %arg5[%c0_8, %c0_9, %c0_10] : memref<1x1x128xf32, #tpu.memory_space<vmem>>, vector<1x1x128xf32>
    %21 = vector.shape_cast %20 : vector<1x1x128xf32> to vector<1x128xf32>
    %cst_11 = arith.constant dense<0.000000e+00> : vector<128xf32>
    %22 = vector.multi_reduction <add>, %17, %cst_11 [0] : vector<32x128xf32> to vector<128xf32>
    %23 = vector.shape_cast %22 : vector<128xf32> to vector<1x128xf32>
    %24 = arith.addf %21, %23 : vector<1x128xf32>
    %c0_12 = arith.constant 0 : index
    %c0_13 = arith.constant 0 : index
    %c0_14 = arith.constant 0 : index
    %25 = vector.load %arg5[%c0_12, %c0_13, %c0_14] : memref<1x1x128xf32, #tpu.memory_space<vmem>>, vector<1x1x128xf32>
    %26 = vector.shape_cast %25 : vector<1x1x128xf32> to vector<1x128xf32>
    %27 = vector.shape_cast %24 : vector<1x128xf32> to vector<1x1x128xf32>
    tpu.vector_store %arg5[%c0_12, %c0_13, %c0_14], %27 {strides = array<i32>} : memref<1x1x128xf32, #tpu.memory_space<vmem>>, vector<1x1x128xf32>,
    %c0_15 = arith.constant 0 : index
    %c0_16 = arith.constant 0 : index
    %c0_17 = arith.constant 0 : index
    %28 = vector.load %arg6[%c0_15, %c0_16, %c0_17] : memref<1x1x128xf32, #tpu.memory_space<vmem>>, vector<1x1x128xf32>
    %29 = vector.shape_cast %28 : vector<1x1x128xf32> to vector<1x128xf32>
    %30 = arith.mulf %17, %17 : vector<32x128xf32>
    %cst_18 = arith.constant dense<0.000000e+00> : vector<128xf32>
    %31 = vector.multi_reduction <add>, %30, %cst_18 [0] : vector<32x128xf32> to vector<128xf32>
    %32 = vector.shape_cast %31 : vector<128xf32> to vector<1x128xf32>
    %33 = arith.addf %29, %32 : vector<1x128xf32>
    %c0_19 = arith.constant 0 : index
    %c0_20 = arith.constant 0 : index
    %c0_21 = arith.constant 0 : index
    %34 = vector.load %arg6[%c0_19, %c0_20, %c0_21] : memref<1x1x128xf32, #tpu.memory_space<vmem>>, vector<1x1x128xf32>
    %35 = vector.shape_cast %34 : vector<1x1x128xf32> to vector<1x128xf32>
    %36 = vector.shape_cast %33 : vector<1x128xf32> to vector<1x1x128xf32>
    tpu.vector_store %arg6[%c0_19, %c0_20, %c0_21], %36 {strides = array<i32>} : memref<1x1x128xf32, #tpu.memory_space<vmem>>, vector<1x1x128xf32>,
    return
  }
  func.func @transform_0(%arg0: i32, %arg1: i32) -> (i32, i32) {
    %c0_i32 = arith.constant 0 : i32
    %c0_i32_0 = arith.constant 0 : i32
    return %arg0, %c0_i32 : i32, i32
  }
  func.func @transform_1(%arg0: i32, %arg1: i32) -> (i32, i32) {
    %c0_i32 = arith.constant 0 : i32
    %c0_i32_0 = arith.constant 0 : i32
    %c0_i32_1 = arith.constant 0 : i32
    return %c0_i32, %c0_i32_0 : i32, i32
  }
  func.func @transform_2(%arg0: i32, %arg1: i32) -> (i32, i32) {
    %c1_i32 = arith.constant 1 : i32
    %0 = arith.muli %arg0, %c1_i32 : i32
    %1 = arith.addi %0, %arg1 : i32
    %c0_i32 = arith.constant 0 : i32
    %c0_i32_0 = arith.constant 0 : i32
    return %1, %c0_i32 : i32, i32
  }
  func.func @transform_3(%arg0: i32, %arg1: i32) -> (i32, i32, i32) {
    %c0_i32 = arith.constant 0 : i32
    %c0_i32_0 = arith.constant 0 : i32
    %c0_i32_1 = arith.constant 0 : i32
    return %arg0, %c0_i32, %c0_i32_0 : i32, i32, i32
  }
  func.func @transform_4(%arg0: i32, %arg1: i32) -> (i32, i32, i32) {
    %c0_i32 = arith.constant 0 : i32
    %c0_i32_0 = arith.constant 0 : i32
    %c0_i32_1 = arith.constant 0 : i32
    return %arg0, %c0_i32, %c0_i32_0 : i32, i32, i32
  }
}

</mosaic_0001>

<bundles_post_ra>
// kernel: tpu_custom_call.1
= control target key start
LH: loop header
LB: loop body
LE: loop exit
PB: predicated region body
PF: predicated region fallthrough
CT: control target
= control target key end

     0   :  { %10 = vsyncpa [#allocation4], 0  ;;  %s741_s0 = inlined_call_operand.hbm [shape: f32[32,64], index: 0, kind: input, shape index: {}]   ;;  %s742_s1 = inlined_call_operand.hbm [shape: bf16[192,128], index: 1, kind: input, shape index: {}]   ;;  %s743_s2 = inlined_call_operand.hbm [shape: bf16[32,128], index: 2, kind: output, shape index: {0}]   ;;  %s744_s3 = inlined_call_operand.hbm [shape: f32[1,1,128], index: 3, kind: output, shape index: {1}]   ;;  %s745_s4 = inlined_call_operand.hbm [shape: f32[1,1,128], index: 4, kind: output, shape index: {2}]  }
   0x1   :  { %11 = vsyncpa [#allocation7], 0 }
   0x2   :  { %12 = vsyncpa [#allocation5], 0 }
   0x3   :  { %13 = vsyncpa [#allocation10], 0  ;;  %s587_s15 = smov [#allocation3]   ;;  %s469_s19 = scalar_lea.hbm %s741_s0, 512 }
   0x4   :  { %s19_s16 = sshll.u32 %s587_s15, 4  ;;  %p470_p0 = scmp.ne.s32.totalorder %s741_s0, %s469_s19  ;;  %s20_s16 = int_to_ptr.vmem [resolvable:$true] %s19_s16 }
   0x5   :  { %p473_p1 = scmp.lt.u32.totalorder %s469_s19, %s741_s0 }
   0x7   :  { %p475_p2 = pnand %p473_p1, %p470_p0 }
   0x9   :  { %478 = shalt.err (!%p475_p2)
}
   0xa   :  { %s479_s24 = scalar_lea.vmem %s20_s16, 512  ;;  %p484_p4 = scmp.lt.s32.totalorder %s20_s16, %s20_s16 }
   0xb   :  { %p480_p3 = scmp.ne.s32.totalorder %s20_s16, %s479_s24  ;;  %p485_p5 = scmp.lt.s32.totalorder %s479_s24, %s479_s24 }
   0xd   :  { %p486_p6 = por %p485_p5, %p484_p4 }
   0xf   :  { %p487_p7 = pnand %p486_p6, %p480_p3 }
  0x11   :  { %490 = shalt.err (!%p487_p7)
}
  0x12   :  { %s588_s25 = smov 128   ;;  %s589_s26 = smov 8  }
  0x13   :  { %25 = dma.hbm_to_vmem [thread:$0]  %s741_s0, 512, %s20_s16, [#allocation4], %s588_s25, %s588_s25, %s589_s26  }
  0x14   :  { %s590_s29 = smov [#allocation6]   ;;  %s491_s7 = scalar_lea.hbm %s742_s1, 1536 }
  0x15   :  { %s31_s30 = sshll.u32 %s590_s29, 4  ;;  %p492_p8 = scmp.ne.s32.totalorder %s742_s1, %s491_s7  ;;  %s32_s30 = int_to_ptr.vmem [resolvable:$true] %s31_s30 }
  0x16   :  { %p495_p9 = scmp.lt.u32.totalorder %s491_s7, %s742_s1 }
  0x18   :  { %p497_p10 = pnand %p495_p9, %p492_p8 }
  0x1a   :  { %500 = shalt.err (!%p497_p10)
}
  0x1b   :  { %s501_s12 = scalar_lea.vmem %s32_s30, 1536  ;;  %p506_p12 = scmp.lt.s32.totalorder %s32_s30, %s32_s30 }
  0x1c   :  { %p502_p11 = scmp.ne.s32.totalorder %s32_s30, %s501_s12  ;;  %p507_p13 = scmp.lt.s32.totalorder %s501_s12, %s501_s12 }
  0x1e   :  { %p508_p0 = por %p507_p13, %p506_p12 }
  0x20   :  { %p509_p1 = pnand %p508_p0, %p502_p11 }
  0x22   :  { %512 = shalt.err (!%p509_p1)
}
  0x23   :  { %s591_s0 = smov 64   ;;  %s592_s13 = smov 4  }
  0x24   :  { %37 = dma.hbm_to_vmem [thread:$0]  %s742_s1, 1536, %s32_s30, [#allocation7], %s591_s0, %s591_s0, %s592_s13  }
  0x25   :  { %579 = dma.done.wait [#allocation4], 512  }
  0x26   :  { %580 = vsyncadd [#allocation4], 4294966784 }
  0x27   :  { %581 = dma.done.wait [#allocation7], 1536  }
  0x28   :  { %582 = vsyncadd [#allocation7], 4294965760  ;;  %vm53_vm0 = vcmask 516096   ;;  %v593_v0 = vmov 0   ;;  %v594_v1 = vmov 0.0   ;;  %vm57_vm1 = vcmask 523264  }
  0x29   :  { %231 = vmatprep.subr.bf16.mxu0 %v593_v0  ;;  %412 = vmatprep.subr.bf16.mxu1 %v593_v0  ;;  %67 = vst.msk [vmem:[#allocation2 + $0x4f] sm:$0x1] %vm53_vm0, %v594_v1  ;;  %51 = vst [vmem:[#allocation9] sm:$0x1] %v594_v1  ;;  %v61_v2 = vld [vmem:[#allocation3] sm:$0xff]  ;;  %v62_v3 = vld [vmem:[#allocation3 + $0x8] sm:$0xff] }
  0x2a   :  { %52 = vst [vmem:[#allocation11] sm:$0x1] %v594_v1  ;;  %54 = vst.msk [vmem:[#allocation2] sm:$0x1] %vm53_vm0, %v594_v1  ;;  %v77_v4 = vld [vmem:[#allocation3 + $0x10] sm:$0xff]  ;;  %v78_v5 = vld [vmem:[#allocation3 + $0x18] sm:$0xff] }
  0x2b   :  { %72 = vst.msk [vmem:[#allocation2 + $0x10] sm:$0x1] %vm53_vm0, %v594_v1  ;;  %81 = vst.msk [vmem:[#allocation2 + $0x5f] sm:$0x1] %vm53_vm0, %v594_v1  ;;  %v457_v6 = vld [vmem:[#allocation6] sm:$0xff]   ;;  %v458_v7 = vld [vmem:[#allocation6 + $0x8] sm:$0xff]  }
  0x2c   :  { %64 = vst.msk [vmem:[#allocation2 + $0x20] sm:$0xff] %vm57_vm1, %v61_v2  ;;  %65 = vst.msk [vmem:[#allocation2 + $0x28] sm:$0xff] %vm57_vm1, %v62_v3  ;;  %232 = vmatpush1.bf16.msra.mxu0 %v457_v6  ;;  %424 = vmatpush1.bf16.msra.mxu1 %v457_v6  ;;  %v459_v8 = vld [vmem:[#allocation6 + $0x10] sm:$0xff]   ;;  %v460_v15 = vld [vmem:[#allocation6 + $0x18] sm:$0xff]   ;;  %vm59_vm2 = vcmask 522240   ;;  %s595_s1 = smov [#allocation8]  }
  0x2d   :  { %79 = vst.msk [vmem:[#allocation2 + $0x30] sm:$0xff] %vm57_vm1, %v77_v4  ;;  %58 = vst.msk [vmem:[#allocation2 + $0x1] sm:$0xff] %vm57_vm1, %v61_v2  ;;  %233 = vmatprep.subr.bf16.mxu0 %v593_v0  ;;  %413 = vmatprep.subr.bf16.mxu1 %v593_v0  ;;  %v68_v16 = vld [vmem:[#allocation3 + $0x1] sm:$0xff]  ;;  %v69_v18 = vld [vmem:[#allocation3 + $0x9] sm:$0x7f]  ;;  %s337_s16 = sshll.u32 %s595_s1, 4  ;;  %s338_s16 = int_to_ptr.vmem [resolvable:$true] %s337_s16 }
  0x2e   :  { %75 = vst.msk [vmem:[#allocation2 + $0x11] sm:$0xff] %vm57_vm1, %v77_v4  ;;  %80 = vst.msk [vmem:[#allocation2 + $0x38] sm:$0xff] %vm57_vm1, %v78_v5  ;;  %v461_v17 = vld [vmem:[#allocation6 + $0x20] sm:$0xff]   ;;  %v56_v19 = vld [vmem:[#allocation3 + $0x8] sm:$0x7f]  ;;  %s513_s17 = scalar_lea.vmem %s338_s16, 256  ;;  %p518_p3 = scmp.lt.s32.totalorder %s338_s16, %s338_s16 }
  0x2f   :  { %70 = vst.msk [vmem:[#allocation2 + $0x40] sm:$0xff] %vm57_vm1, %v68_v16  ;;  %v82_v20 = vld [vmem:[#allocation3 + $0x11] sm:$0xff]  ;;  %v83_v21 = vld [vmem:[#allocation3 + $0x19] sm:$0x7f]  ;;  %v462_v23 = vld [vmem:[#allocation6 + $0x28] sm:$0xff]   ;;  %p514_p2 = scmp.ne.s32.totalorder %s338_s16, %s513_s17  ;;  %p519_p4 = scmp.lt.s32.totalorder %s513_s17, %s513_s17 }
  0x30   :  { %234 = vmatpush1.bf16.msra.mxu0 %v458_v7  ;;  %425 = vmatpush1.bf16.msra.mxu1 %v458_v7  ;;  %71 = vst.msk [vmem:[#allocation2 + $0x48] sm:$0x7f] %vm59_vm2, %v69_v18  ;;  %60 = vst.msk [vmem:[#allocation2 + $0x9] sm:$0x7f] %vm59_vm2, %v56_v19  ;;  %v74_v22 = vld [vmem:[#allocation3 + $0x18] sm:$0x7f] }
  0x31   :  { %235 = vmatprep.subr.bf16.mxu0 %v593_v0  ;;  %414 = vmatprep.subr.bf16.mxu1 %v593_v0  ;;  %84 = vst.msk [vmem:[#allocation2 + $0x50] sm:$0xff] %vm57_vm1, %v82_v20  ;;  %v463_v26 = vld [vmem:[#allocation6 + $0x30] sm:$0xff]   ;;  %v464_v31 = vld [vmem:[#allocation6 + $0x38] sm:$0xff]   ;;  %v465_v32 = vld [vmem:[#allocation6 + $0x40] sm:$0xff]   ;;  %p520_p5 = por %p519_p4, %p518_p3 }
  0x32   :  { %85 = vst.msk [vmem:[#allocation2 + $0x58] sm:$0x7f] %vm59_vm2, %v83_v21  ;;  %76 = vst.msk [vmem:[#allocation2 + $0x19] sm:$0x7f] %vm59_vm2, %v74_v22  ;;  %v466_v33 = vld [vmem:[#allocation6 + $0x48] sm:$0xff]   ;;  %v467_v34 = vld [vmem:[#allocation6 + $0x50] sm:$0xff]  }
  0x33   :  { %v94_v9 = vld [vmem:[#allocation2 + $0x20] sm:$0xff]  ;;  %v95_v10 = vld [vmem:[#allocation2 + $0x28] sm:$0xff]  ;;  %v468_v35 = vld [vmem:[#allocation6 + $0x58] sm:$0xff]   ;;  %p521_p6 = pnand %p520_p5, %p514_p2 }
  0x34   :  { %v96_v11 = vld [vmem:[#allocation2 + $0x30] sm:$0xff]  ;;  %v447_v12 = vpack.i.bf16 %v95_v10, %v94_v9  ;;  %236 = vmatpush1.bf16.msra.mxu0 %v459_v8  ;;  %426 = vmatpush1.bf16.msra.mxu1 %v459_v8  ;;  %v88_v37 = vld [vmem:[#allocation2] sm:$0xff] }
  0x35   :  { %v97_v13 = vld [vmem:[#allocation2 + $0x38] sm:$0xff]  ;;  %237 = vmatprep.subr.bf16.mxu0 %v593_v0  ;;  %415 = vmatprep.subr.bf16.mxu1 %v593_v0  ;;  %v90_v45 = vld [vmem:[#allocation2 + $0x10] sm:$0xff] }
  0x36   :  { %448 = vrot.lane.b32.xlu0 %v447_v12, %s591_s0  ;;  %v452_v14 = vpack.i.bf16 %v97_v13, %v96_v11  ;;  %v100_v24 = vld [vmem:[#allocation2 + $0x40] sm:$0xff] }
  0x37   :  { %v101_v25 = vld [vmem:[#allocation2 + $0x48] sm:$0xff] }
  0x38   :  { %238 = vmatpush1.bf16.msra.mxu0 %v460_v15  ;;  %427 = vmatpush1.bf16.msra.mxu1 %v460_v15  ;;  %v126_v27 = vpack.c.bf16 %v101_v25, %v100_v24  ;;  %v102_v28 = vld [vmem:[#allocation2 + $0x50] sm:$0xff]  ;;  %v89_v38 = vld [vmem:[#allocation2 + $0x8] sm:$0xff] }
  0x39   :  { %239 = vmatprep.subr.bf16.mxu0 %v593_v0  ;;  %416 = vmatprep.subr.bf16.mxu1 %v593_v0  ;;  %v103_v29 = vld [vmem:[#allocation2 + $0x58] sm:$0xff] }
  0x3a   :  { %453 = vrot.lane.b32.xlu0 %v452_v14, %s591_s0  ;;  %v128_v30 = vpack.c.bf16 %v103_v29, %v102_v28  ;;  %391 = vmatprep.mubr.msk.bf16.mxu0 %vm57_vm1, %v126_v27  ;;  %v91_v46 = vld [vmem:[#allocation2 + $0x18] sm:$0xff] }
  0x3c   :  { %240 = vmatpush1.bf16.msra.mxu0 %v461_v17  ;;  %428 = vmatpush1.bf16.msra.mxu1 %v461_v17 }
  0x3d   :  { %241 = vmatprep.subr.bf16.mxu0 %v593_v0  ;;  %417 = vmatprep.subr.bf16.mxu1 %v593_v0 }
  0x3e   :  { %392 = vmatprep.mubr.msk.bf16.mxu1 %vm57_vm1, %v128_v30 }
  0x40   :  { %242 = vmatpush1.bf16.msra.mxu0 %v462_v23  ;;  %429 = vmatpush1.bf16.msra.mxu1 %v462_v23 }
  0x41   :  { %243 = vmatprep.subr.bf16.mxu0 %v593_v0  ;;  %418 = vmatprep.subr.bf16.mxu1 %v593_v0 }
  0x44   :  { %244 = vmatpush1.bf16.msra.mxu0 %v463_v26  ;;  %430 = vmatpush1.bf16.msra.mxu1 %v463_v26 }
  0x45   :  { %245 = vmatprep.subr.bf16.mxu0 %v593_v0  ;;  %419 = vmatprep.subr.bf16.mxu1 %v593_v0 }
  0x48   :  { %246 = vmatpush1.bf16.msra.mxu0 %v464_v31  ;;  %431 = vmatpush1.bf16.msra.mxu1 %v464_v31 }
  0x49   :  { %247 = vmatprep.subr.bf16.mxu0 %v593_v0  ;;  %420 = vmatprep.subr.bf16.mxu1 %v593_v0 }
  0x4c   :  { %248 = vmatpush1.bf16.msra.mxu0 %v465_v32  ;;  %432 = vmatpush1.bf16.msra.mxu1 %v465_v32 }
  0x4d   :  { %249 = vmatprep.subr.bf16.mxu0 %v593_v0  ;;  %421 = vmatprep.subr.bf16.mxu1 %v593_v0 }
  0x50   :  { %250 = vmatpush1.bf16.msra.mxu0 %v466_v33  ;;  %433 = vmatpush1.bf16.msra.mxu1 %v466_v33 }
  0x51   :  { %251 = vmatprep.subr.bf16.mxu0 %v593_v0  ;;  %422 = vmatprep.subr.bf16.mxu1 %v593_v0 }
  0x54   :  { %252 = vmatpush1.bf16.msra.mxu0 %v467_v34  ;;  %434 = vmatpush1.bf16.msra.mxu1 %v467_v34 }
  0x55   :  { %253 = vmatprep.subr.bf16.mxu0 %v593_v0  ;;  %423 = vmatprep.subr.bf16.mxu1 %v593_v0 }
  0x58   :  { %254 = vmatpush1.bf16.msra.mxu0 %v468_v35  ;;  %435 = vmatpush1.bf16.msra.mxu1 %v468_v35 }
  0xa8   :  { %v449_v36 = vpop.permute.xlu0 %448 }
  0xa9   :  { %v451_v39 = vunpack.i.h.bf16 %v449_v36  ;;  %v450_v40 = vunpack.i.l.bf16 %v449_v36 }
  0xab   :  { %v121_v41 = vsel %vm57_vm1, %v88_v37, %v450_v40  ;;  %v122_v42 = vsel %vm57_vm1, %v89_v38, %v451_v39 }
  0xac   :  { %v454_v43 = vpop.permute.xlu0 %453  ;;  %v125_v44 = vpack.c.bf16 %v122_v42, %v121_v41 }
  0xad   :  { %v456_v47 = vunpack.i.h.bf16 %v454_v43  ;;  %v455_v48 = vunpack.i.l.bf16 %v454_v43 }
  0xae   :  { %264 = vmatmul.mubr.bf16.vlgmr.msra.gmra.mrb[0].mxu0 %v125_v44 }
  0xaf   :  { %v123_v49 = vsel %vm57_vm1, %v90_v45, %v455_v48  ;;  %v124_v50 = vsel %vm57_vm1, %v91_v46, %v456_v47 }
  0xb0   :  { %v127_v51 = vpack.c.bf16 %v124_v50, %v123_v49 }
  0xb2   :  { %272 = vmatmul.mubr.bf16.vlgmr.msra.gmra.mrb[0].mxu1 %v127_v51 }
 0x181   :  { %v265_v52 = vpop.f32.mrb[0].mxu0 }
 0x182   :  { %v267_v53 = vpop.f32.mrb[1].mxu0  ;;  %v313_v55 = vmul.f32 %v265_v52, %v265_v52 }
 0x183   :  { %v268_v54 = vpop.f32.mrb[2].mxu0 }
 0x184   :  { %v404_v56 = vpack.c.bf16 %v268_v54, %v265_v52  ;;  %v301_v57 = vadd.f32 %v268_v54, %v265_v52  ;;  %v314_v58 = vmul.f32 %v268_v54, %v268_v54  ;;  %v270_v59 = vpop.f32.mrb[3].mxu0 }
 0x185   :  { %v273_v60 = vpop.f32.mrb[0].mxu1 }
 0x186   :  { %v317_v61 = vadd.f32 %v314_v58, %v313_v55  ;;  %405 = vst [vmem:[#allocation8] sm:$0xff] %v404_v56   ;;  %v302_v62 = vadd.f32 %v301_v57, %v273_v60  ;;  %v315_v63 = vmul.f32 %v273_v60, %v273_v60  ;;  %v275_v0 = vpop.f32.mrb[1].mxu1 }
 0x187   :  { %v276_v1 = vpop.f32.mrb[2].mxu1 }
 0x188   :  { %v318_v2 = vadd.f32 %v317_v61, %v315_v63  ;;  %v409_v3 = vpack.c.bf16 %v276_v1, %v273_v60  ;;  %v303_v4 = vadd.f32 %v302_v62, %v276_v1  ;;  %v316_v5 = vmul.f32 %v276_v1, %v276_v1  ;;  %v278_v6 = vpop.f32.mrb[3].mxu1 }
 0x18a   :  { %v304_v7 = vrot.slane %v303_v4, 4  ;;  %v319_v8 = vadd.f32 %v318_v2, %v316_v5  ;;  %411 = vst [vmem:[#allocation8 + $0x8] sm:$0xff] %v409_v3  }
 0x18b   :  { %524 = shalt.err (!%p521_p6)
}
 0x18c   :  { %s525_s20 = scalar_lea.hbm %s743_s2, 256 }
 0x18d   :  { %p526_p7 = scmp.ne.s32.totalorder %s743_s2, %s525_s20  ;;  %p529_p8 = scmp.lt.u32.totalorder %s525_s20, %s743_s2 }
 0x18f   :  { %p531_p9 = pnand %p529_p8, %p526_p7 }
 0x191   :  { %534 = shalt.err (!%p531_p9)
}
 0x192   :  { %343 = dma.vmem_to_hbm [thread:$0]  %s338_s16, 256, %s743_s2, [#allocation5], %s591_s0, %s591_s0, %s592_s13   ;;  %v305_v9 = vadd.f32 %v304_v7, %v303_v4  ;;  %v320_v10 = vrot.slane %v319_v8, 4  ;;  %v300_v17 = vld [vmem:[#allocation9] sm:$0x1] }
 0x193   :  { %s596_s27 = smov [#allocation9]   ;;  %v312_v20 = vld [vmem:[#allocation11] sm:$0x1]  ;;  %s597_s29 = smov [#allocation11]  }
 0x194   :  { %v306_v11 = vrot.slane %v305_v9, 2  ;;  %v321_v12 = vadd.f32 %v320_v10, %v319_v8  ;;  %s350_s28 = sshll.u32 %s596_s27, 4  ;;  %s360_s30 = sshll.u32 %s597_s29, 4  ;;  %s351_s28 = int_to_ptr.vmem [resolvable:$true] %s350_s28  ;;  %s709_s30 = int_to_ptr.vmem [resolvable:$true] %s360_s30 }
 0x195   :  { %s535_s2 = scalar_lea.vmem %s351_s28, 16  ;;  %s539_s5 = scalar_lea.vmem %s351_s28, 32 }
 0x196   :  { %v307_v13 = vadd.f32 %v306_v11, %v305_v9  ;;  %v322_v14 = vrot.slane %v321_v12, 2  ;;  %p536_p10 = scmp.ne.s32.totalorder %s351_s28, %s535_s2  ;;  %p540_p11 = scmp.lt.s32.totalorder %s351_s28, %s351_s28 }
 0x197   :  { %p541_p12 = scmp.lt.s32.totalorder %s539_s5, %s535_s2 }
 0x198   :  { %v308_v15 = vrot.slane %v307_v13, 1  ;;  %v323_v16 = vadd.f32 %v322_v14, %v321_v12 }
 0x199   :  { %p542_p13 = por %p541_p12, %p540_p11 }
 0x19a   :  { %v324_v18 = vrot.slane %v323_v16, 1  ;;  %v309_v19 = vadd.f32 %v308_v15, %v307_v13 }
 0x19b   :  { %p543_p0 = pnand %p542_p13, %p536_p10 }
 0x19c   :  { %v310_v21 = vadd.f32 %v309_v19, %v300_v17  ;;  %v325_v22 = vadd.f32 %v324_v18, %v323_v16 }
 0x19e   :  { %311 = vst [vmem:[#allocation9] sm:$0x1] %v310_v21  ;;  %v326_v23 = vadd.f32 %v325_v22, %v312_v20 }
 0x19f   :  { %546 = shalt.err (!%p543_p0)
}
 0x1a0   :  { %s547_s8 = scalar_lea.hbm %s744_s3, 16 }
 0x1a1   :  { %p548_p1 = scmp.ne.s32.totalorder %s744_s3, %s547_s8  ;;  %p551_p2 = scmp.lt.u32.totalorder %s547_s8, %s744_s3 }
 0x1a3   :  { %p553_p3 = pnand %p551_p2, %p548_p1 }
 0x1a5   :  { %556 = shalt.err (!%p553_p3)
}
 0x1a6   :  { %353 = dma.vmem_to_hbm [thread:$0]  %s351_s28, 16, %s744_s3, [#allocation10]   ;;  %327 = vst [vmem:[#allocation11] sm:$0x1] %v326_v23 }
 0x1a7   :  { %s557_s14 = scalar_lea.vmem %s709_s30, 16  ;;  %s561_s15 = scalar_lea.vmem %s709_s30, 32 }
 0x1a8   :  { %p558_p4 = scmp.ne.s32.totalorder %s709_s30, %s557_s14  ;;  %p562_p5 = scmp.lt.s32.totalorder %s709_s30, %s709_s30 }
 0x1a9   :  { %p563_p6 = scmp.lt.s32.totalorder %s561_s15, %s557_s14 }
 0x1ab   :  { %p564_p7 = por %p563_p6, %p562_p5 }
 0x1ad   :  { %p565_p8 = pnand %p564_p7, %p558_p4 }
 0x1af   :  { %568 = shalt.err (!%p565_p8)
}
 0x1b0   :  { %s569_s17 = scalar_lea.hbm %s745_s4, 16 }
 0x1b1   :  { %p570_p9 = scmp.ne.s32.totalorder %s745_s4, %s569_s17  ;;  %p573_p10 = scmp.lt.u32.totalorder %s569_s17, %s745_s4 }
 0x1b3   :  { %p575_p11 = pnand %p573_p10, %p570_p9 }
 0x1b5   :  { %578 = shalt.err (!%p575_p11)
}
 0x1b6   :  { %363 = dma.vmem_to_hbm [thread:$0]  %s709_s30, 16, %s745_s4, [#allocation10]  }
 0x1b7   :  { %583 = dma.done.wait [#allocation5], 256  }
 0x1b8   :  { %584 = vsyncadd [#allocation5], 4294967040 }
 0x1b9   :  { %585 = dma.done.wait [#allocation10], 32  }
 0x1ba   :  { %586 = vsyncadd [#allocation10], 4294967264 }
 0x1bb   :  { %373 = vsyncpa [#allocation4], 1 }
 0x1bc   :  { %374 = vsyncpa [#allocation7], 1 }
 0x1bd   :  { %375 = vsyncpa [#allocation5], 1 }
 0x1be   :  { %376 = vsyncpa [#allocation10], 1 }

</bundles_post_ra>
